<compile_context>
chip_gen: v6e
topology: v6e:2x2x1
jax: 0.10.0
libtpu: 0.0.40
codegen_flags: <defaults>
</compile_context>

<pallas_src>
import jax
import jax.numpy as jnp
from jax.experimental import pallas as pl
from jax.experimental.pallas import tpu as pltpu


def _round_up(x, m):
    return (x + m - 1) // m * m


def _discriminator_kernel(x_ref, w1_ref, b1_ref, w2_ref, b2_ref,
                          w3_ref, b3_ref, o_ref):
    # ---- layer 1: Linear + LeakyReLU(0.1)  (bf16 operands, f32 accum) ----
    h = jnp.dot(x_ref[...], w1_ref[...],
                preferred_element_type=jnp.float32) + b1_ref[...]
    h = jnp.where(h > 0, h, 0.1 * h)                    # f32 on the VPU
    # ---- layer 2: Linear + LeakyReLU(0.1) ----
    h = jnp.dot(h.astype(jnp.bfloat16), w2_ref[...],
                preferred_element_type=jnp.float32) + b2_ref[...]
    h = jnp.where(h > 0, h, 0.1 * h)
    # ---- layer 3 (padded to 128 lanes): Linear + Sigmoid ----
    h = jnp.dot(h.astype(jnp.bfloat16), w3_ref[...],
                preferred_element_type=jnp.float32) + b3_ref[...]
    # sigmoid = 1 / (1 + exp(-h)); exp and approx-reciprocal both hit the EUP.
    o_ref[...] = pl.reciprocal(1.0 + jnp.exp(-h), approx=True).astype(o_ref.dtype)


def discriminator_forward(x, params, *, block_b=None):
    """x: (B, input_size) f32.  params: dict of w1,b1,w2,b2,w3,b3 (f32, (in,out))."""
    w1 = params["w1"].astype(jnp.bfloat16)
    w2 = params["w2"].astype(jnp.bfloat16)
    w3 = params["w3"].astype(jnp.bfloat16)
    b1 = params["b1"].astype(jnp.float32)
    b2 = params["b2"].astype(jnp.float32)
    b3 = params["b3"].astype(jnp.float32)

    B, D_in = x.shape
    H = w1.shape[1]
    D_out = w3.shape[1]
    D_out_pad = _round_up(D_out, 128)          # lane-dense output store

    # Batch tile: multiple of 128 (>= 2 grid steps for B >= 256 so the x DMA
    # pipelines and v7x can megacore-shard), capped at 256 for vreg pressure.
    if block_b is None:
        block_b = 128 if B <= 256 else 256
    B_pad = _round_up(B, block_b)
    grid = (B_pad // block_b,)

    x_p = x.astype(jnp.bfloat16)
    if B_pad != B:
        x_p = jnp.pad(x_p, ((0, B_pad - B), (0, 0)))
    if D_out_pad != D_out:
        w3 = jnp.pad(w3, ((0, 0), (0, D_out_pad - D_out)))
        b3 = jnp.pad(b3, ((0, 0), (0, D_out_pad - D_out)))

    vmem = pltpu.MemorySpace.VMEM
    out = pl.pallas_call(
        _discriminator_kernel,
        out_shape=jax.ShapeDtypeStruct((B_pad, D_out_pad), jnp.float32),
        grid=grid,
        in_specs=[
            pl.BlockSpec((block_b, D_in), lambda i: (i, 0), memory_space=vmem),
            pl.BlockSpec((D_in, H), lambda i: (0, 0), memory_space=vmem),
            pl.BlockSpec((1, H), lambda i: (0, 0), memory_space=vmem),
            pl.BlockSpec((H, H), lambda i: (0, 0), memory_space=vmem),
            pl.BlockSpec((1, H), lambda i: (0, 0), memory_space=vmem),
            pl.BlockSpec((H, D_out_pad), lambda i: (0, 0), memory_space=vmem),
            pl.BlockSpec((1, D_out_pad), lambda i: (0, 0), memory_space=vmem),
        ],
        out_specs=pl.BlockSpec((block_b, D_out_pad), lambda i: (i, 0),
                               memory_space=vmem),
        compiler_params=pltpu.CompilerParams(
            dimension_semantics=("parallel",)),   # megacore-shardable on v7x
    )(x_p, w1, b1, w2, b2, w3, b3)
    return out[:B, :D_out]


def init_params(key, input_size, output_size, hidden_units=128):
    """Deterministic synthetic init. Weights stored as (in, out)."""
    k1, k2, k3, k4, k5, k6 = jax.random.split(key, 6)
    s1 = 1.0 / jnp.sqrt(input_size)
    s2 = 1.0 / jnp.sqrt(hidden_units)
    return {
        "w1": jax.random.uniform(k1, (input_size, hidden_units), jnp.float32,
                                 -s1, s1),
        "b1": jax.random.uniform(k2, (1, hidden_units), jnp.float32, -s1, s1),
        "w2": jax.random.uniform(k3, (hidden_units, hidden_units), jnp.float32,
                                 -s2, s2),
        "b2": jax.random.uniform(k4, (1, hidden_units), jnp.float32, -s2, s2),
        "w3": jax.random.uniform(k5, (hidden_units, output_size), jnp.float32,
                                 -s2, s2),
        "b3": jax.random.uniform(k6, (1, output_size), jnp.float32, -s2, s2),
    }


def discriminator_ref_f32(x, p):
    """Full-f32 reference (PyTorch semantics)."""
    h = x @ p["w1"] + p["b1"]
    h = jnp.where(h > 0, h, 0.1 * h)
    h = h @ p["w2"] + p["b2"]
    h = jnp.where(h > 0, h, 0.1 * h)
    h = h @ p["w3"] + p["b3"]
    return jax.nn.sigmoid(h)


def discriminator_ref_bf16(x, p):
    """Reference with the same bf16-operand / f32-accum matmul recipe."""
    bf = jnp.bfloat16
    h = jnp.dot(x.astype(bf), p["w1"].astype(bf),
                preferred_element_type=jnp.float32) + p["b1"]
    h = jnp.where(h > 0, h, 0.1 * h)
    h = jnp.dot(h.astype(bf), p["w2"].astype(bf),
                preferred_element_type=jnp.float32) + p["b2"]
    h = jnp.where(h > 0, h, 0.1 * h)
    h = jnp.dot(h.astype(bf), p["w3"].astype(bf),
                preferred_element_type=jnp.float32) + p["b3"]
    return jax.nn.sigmoid(h)


if __name__ == "__main__":
    key = jax.random.PRNGKey(0)
    kx, kp = jax.random.split(key)

    # batch=256 -> block_b=128, grid=(2,): pipelined + megacore-shardable.
    batch, input_size, hidden_units, output_size = 256, 64, 128, 1
    x = jax.random.normal(kx, (batch, input_size), jnp.float32)
    params = init_params(kp, input_size, output_size, hidden_units)

    out = discriminator_forward(x, params)
    out = jax.block_until_ready(out)

    assert out.shape == (batch, output_size), out.shape
    ref_bf16 = discriminator_ref_bf16(x, params)   # same numerics recipe
    ref_f32 = discriminator_ref_f32(x, params)     # PyTorch-exact semantics
    err_bf16 = float(jnp.max(jnp.abs(out - ref_bf16)))
    err_f32 = float(jnp.max(jnp.abs(out - ref_f32)))
    assert jnp.allclose(out, ref_bf16, atol=5e-3, rtol=5e-3), err_bf16
    assert jnp.allclose(out, ref_f32, atol=2e-2, rtol=2e-2), err_f32

    print("KERNEL_OK")
</pallas_src>

<mosaic_0001>
module attributes {stable_mosaic.version = 11 : i64} {
  func.func @_discriminator_kernel(%arg0: i32, %arg1: memref<128x64xbf16, #tpu.memory_space<vmem>>, %arg2: memref<64x128xbf16, #tpu.memory_space<vmem>>, %arg3: memref<1x128xf32, #tpu.memory_space<vmem>>, %arg4: memref<128x128xbf16, #tpu.memory_space<vmem>>, %arg5: memref<1x128xf32, #tpu.memory_space<vmem>>, %arg6: memref<128x128xbf16, #tpu.memory_space<vmem>>, %arg7: memref<1x128xf32, #tpu.memory_space<vmem>>, %arg8: memref<128x128xf32, #tpu.memory_space<vmem>>) attributes {dimension_semantics = [#tpu.dimension_semantics<parallel>], iteration_bounds = array<i64: 2>, scalar_prefetch = 0 : i64, scratch_operands = 0 : i64, tpu.core_type = #tpu.core_type<tc>, window_params = [{transform_indices = @transform_0, window_bounds = array<i64: 128, 64>}, {pipeline_mode = #tpu.pipeline_mode<synchronous>, transform_indices = @transform_1, window_bounds = array<i64: 64, 128>}, {pipeline_mode = #tpu.pipeline_mode<synchronous>, transform_indices = @transform_2, window_bounds = array<i64: 1, 128>}, {pipeline_mode = #tpu.pipeline_mode<synchronous>, transform_indices = @transform_3, window_bounds = array<i64: 128, 128>}, {pipeline_mode = #tpu.pipeline_mode<synchronous>, transform_indices = @transform_4, window_bounds = array<i64: 1, 128>}, {pipeline_mode = #tpu.pipeline_mode<synchronous>, transform_indices = @transform_5, window_bounds = array<i64: 128, 128>}, {pipeline_mode = #tpu.pipeline_mode<synchronous>, transform_indices = @transform_6, window_bounds = array<i64: 1, 128>}, {transform_indices = @transform_7, window_bounds = array<i64: 128, 128>}]} {
    %c0 = arith.constant 0 : index
    %c0_0 = arith.constant 0 : index
    %0 = vector.load %arg1[%c0, %c0_0] : memref<128x64xbf16, #tpu.memory_space<vmem>>, vector<128x64xbf16>
    %c0_1 = arith.constant 0 : index
    %c0_2 = arith.constant 0 : index
    %1 = vector.load %arg2[%c0_1, %c0_2] : memref<64x128xbf16, #tpu.memory_space<vmem>>, vector<64x128xbf16>
    %cst = arith.constant dense<0.000000e+00> : vector<128x128xf32>
    %2 = tpu.matmul %0, %1, %cst {dimension_numbers = #tpu.dot_dimension_numbers<[1], [0], [0], [1], [0, 0, 1, 1], [], []>} : vector<128x64xbf16>, vector<64x128xbf16>, vector<128x128xf32> -> vector<128x128xf32>
    %c0_3 = arith.constant 0 : index
    %c0_4 = arith.constant 0 : index
    %3 = vector.load %arg3[%c0_3, %c0_4] : memref<1x128xf32, #tpu.memory_space<vmem>>, vector<1x128xf32>
    %4 = vector.broadcast %3 : vector<1x128xf32> to vector<128x128xf32>
    %5 = arith.addf %2, %4 : vector<128x128xf32>
    %cst_5 = arith.constant 0.000000e+00 : f32
    %6 = vector.broadcast %cst_5 : f32 to vector<128x128xf32>
    %7 = arith.cmpf ogt, %5, %6 : vector<128x128xf32>
    %cst_6 = arith.constant 1.000000e-01 : f32
    %8 = vector.broadcast %cst_6 : f32 to vector<128x128xf32>
    %9 = arith.mulf %8, %5 : vector<128x128xf32>
    %10 = arith.select %7, %5, %9 : vector<128x128xi1>, vector<128x128xf32>
    %11 = arith.truncf %10 : vector<128x128xf32> to vector<128x128xbf16>
    %c0_7 = arith.constant 0 : index
    %c0_8 = arith.constant 0 : index
    %12 = vector.load %arg4[%c0_7, %c0_8] : memref<128x128xbf16, #tpu.memory_space<vmem>>, vector<128x128xbf16>
    %cst_9 = arith.constant dense<0.000000e+00> : vector<128x128xf32>
    %13 = tpu.matmul %11, %12, %cst_9 {dimension_numbers = #tpu.dot_dimension_numbers<[1], [0], [0], [1], [0, 0, 1, 1], [], []>} : vector<128x128xbf16>, vector<128x128xbf16>, vector<128x128xf32> -> vector<128x128xf32>
    %c0_10 = arith.constant 0 : index
    %c0_11 = arith.constant 0 : index
    %14 = vector.load %arg5[%c0_10, %c0_11] : memref<1x128xf32, #tpu.memory_space<vmem>>, vector<1x128xf32>
    %15 = vector.broadcast %14 : vector<1x128xf32> to vector<128x128xf32>
    %16 = arith.addf %13, %15 : vector<128x128xf32>
    %cst_12 = arith.constant 0.000000e+00 : f32
    %17 = vector.broadcast %cst_12 : f32 to vector<128x128xf32>
    %18 = arith.cmpf ogt, %16, %17 : vector<128x128xf32>
    %cst_13 = arith.constant 1.000000e-01 : f32
    %19 = vector.broadcast %cst_13 : f32 to vector<128x128xf32>
    %20 = arith.mulf %19, %16 : vector<128x128xf32>
    %21 = arith.select %18, %16, %20 : vector<128x128xi1>, vector<128x128xf32>
    %22 = arith.truncf %21 : vector<128x128xf32> to vector<128x128xbf16>
    %c0_14 = arith.constant 0 : index
    %c0_15 = arith.constant 0 : index
    %23 = vector.load %arg6[%c0_14, %c0_15] : memref<128x128xbf16, #tpu.memory_space<vmem>>, vector<128x128xbf16>
    %cst_16 = arith.constant dense<0.000000e+00> : vector<128x128xf32>
    %24 = tpu.matmul %22, %23, %cst_16 {dimension_numbers = #tpu.dot_dimension_numbers<[1], [0], [0], [1], [0, 0, 1, 1], [], []>} : vector<128x128xbf16>, vector<128x128xbf16>, vector<128x128xf32> -> vector<128x128xf32>
    %c0_17 = arith.constant 0 : index
    %c0_18 = arith.constant 0 : index
    %25 = vector.load %arg7[%c0_17, %c0_18] : memref<1x128xf32, #tpu.memory_space<vmem>>, vector<1x128xf32>
    %26 = vector.broadcast %25 : vector<1x128xf32> to vector<128x128xf32>
    %27 = arith.addf %24, %26 : vector<128x128xf32>
    %cst_19 = arith.constant 0.000000e+00 : f32
    %28 = vector.broadcast %cst_19 : f32 to vector<128x128xf32>
    %29 = arith.subf %28, %27 : vector<128x128xf32>
    %30 = math.exp %29 : vector<128x128xf32>
    %cst_20 = arith.constant 1.000000e+00 : f32
    %31 = vector.broadcast %cst_20 : f32 to vector<128x128xf32>
    %32 = arith.addf %31, %30 : vector<128x128xf32>
    %33 = tpu.reciprocal %32 {approx = true} : vector<128x128xf32> -> vector<128x128xf32>
    %c0_21 = arith.constant 0 : index
    %c0_22 = arith.constant 0 : index
    %34 = vector.load %arg8[%c0_21, %c0_22] : memref<128x128xf32, #tpu.memory_space<vmem>>, vector<128x128xf32>
    tpu.vector_store %arg8[%c0_21, %c0_22], %33 {strides = array<i32>} : memref<128x128xf32, #tpu.memory_space<vmem>>, vector<128x128xf32>,
    return
  }
  func.func @transform_0(%arg0: i32) -> (i32, i32) {
    %c0_i32 = arith.constant 0 : i32
    %c0_i32_0 = arith.constant 0 : i32
    return %arg0, %c0_i32 : i32, i32
  }
  func.func @transform_1(%arg0: i32) -> (i32, i32) {
    %c0_i32 = arith.constant 0 : i32
    %c0_i32_0 = arith.constant 0 : i32
    %c0_i32_1 = arith.constant 0 : i32
    return %c0_i32, %c0_i32_0 : i32, i32
  }
  func.func @transform_2(%arg0: i32) -> (i32, i32) {
    %c0_i32 = arith.constant 0 : i32
    %c0_i32_0 = arith.constant 0 : i32
    %c0_i32_1 = arith.constant 0 : i32
    return %c0_i32, %c0_i32_0 : i32, i32
  }
  func.func @transform_3(%arg0: i32) -> (i32, i32) {
    %c0_i32 = arith.constant 0 : i32
    %c0_i32_0 = arith.constant 0 : i32
    %c0_i32_1 = arith.constant 0 : i32
    return %c0_i32, %c0_i32_0 : i32, i32
  }
  func.func @transform_4(%arg0: i32) -> (i32, i32) {
    %c0_i32 = arith.constant 0 : i32
    %c0_i32_0 = arith.constant 0 : i32
    %c0_i32_1 = arith.constant 0 : i32
    return %c0_i32, %c0_i32_0 : i32, i32
  }
  func.func @transform_5(%arg0: i32) -> (i32, i32) {
    %c0_i32 = arith.constant 0 : i32
    %c0_i32_0 = arith.constant 0 : i32
    %c0_i32_1 = arith.constant 0 : i32
    return %c0_i32, %c0_i32_0 : i32, i32
  }
  func.func @transform_6(%arg0: i32) -> (i32, i32) {
    %c0_i32 = arith.constant 0 : i32
    %c0_i32_0 = arith.constant 0 : i32
    %c0_i32_1 = arith.constant 0 : i32
    return %c0_i32, %c0_i32_0 : i32, i32
  }
  func.func @transform_7(%arg0: i32) -> (i32, i32) {
    %c0_i32 = arith.constant 0 : i32
    %c0_i32_0 = arith.constant 0 : i32
    return %arg0, %c0_i32 : i32, i32
  }
}

</mosaic_0001>

<bundles_post_ra>
// kernel: tpu_custom_call.1
= control target key start
LH: loop header
LB: loop body
LE: loop exit
PB: predicated region body
PF: predicated region fallthrough
CT: control target
= control target key end

     0   :  { %12 = vsyncpa [#allocation3], 0  ;;  %s1845_s0 = inlined_call_operand.vmem [shape: bf16[256,64], index: 0, kind: input, shape index: {}]   ;;  %s1846_s1 = inlined_call_operand.vmem [shape: bf16[64,128], index: 1, kind: input, shape index: {}]   ;;  %s1847_s2 = inlined_call_operand.vmem [shape: f32[1,128], index: 2, kind: input, shape index: {}]   ;;  %s1848_s3 = inlined_call_operand.vmem [shape: bf16[128,128], index: 3, kind: input, shape index: {}]   ;;  %s1849_s4 = inlined_call_operand.vmem [shape: f32[1,128], index: 4, kind: input, shape index: {}]   ;;  %s1850_s5 = inlined_call_operand.vmem [shape: bf16[128,128], index: 5, kind: input, shape index: {}]   ;;  %s1851_s6 = inlined_call_operand.vmem [shape: f32[1,128], index: 6, kind: input, shape index: {}]   ;;  %s1852_s7 = inlined_call_operand.hbm [shape: f32[256,128], index: 7, kind: output, shape index: {}]  }
   0x1   :  { %14 = vsyncpa [#allocation3 + $0x1], 0  ;;  %s1556_s24 = smov 0   ;;  %s1558_s25 = smov 0  }
   0x2   :  { %s1560_s26 = smov 0   ;;  %s1562_s27 = smov 0  }
   0x3 LB: > { %s1577_s28 = sadd.s32 4294967295, %s1511_s27   ;;  %s1118_s29 = sadd.s32 4294967294, %s1511_s27   ;;  %s1511_s27 = sphi %s1562_s27, %s1858_s27   ;;  %s1507_s26 = sphi %s1560_s26, %s1857_s26   ;;  %s1503_s25 = sphi %s1558_s25, %s1856_s25   ;;  %s1499_s24 = sphi %s1556_s24, %s1855_s24  }
   0x4   : > { %s1581_s30 = sadd.s32 1, %s1511_s27   ;;  %s179_s8 = sadd.s32 1, %s1507_s26 }
   0x5   : > { %s176_s9 = ssub.s32 %s1511_s27, %s1581_s30  ;;  %p189_p0 = scmp.ne.s32.totalorder %s1507_s26, %s1503_s25 }
   0x6   : > { %p177_p1 = scmp.eq.s32.totalorder %s176_s9, 0  ;;  %p190_p2 = scmp.eq.s32.totalorder %s1577_s28, 1 }
   0x7   : > { %p195_p3 = scmp.ne.s32.totalorder %s1503_s25, %s1499_s24  ;;  %p196_p4 = scmp.eq.s32.totalorder %s1118_s29, 1 }
   0x8   : > { %s1592_s10 = scalar_select %p177_p1, %s1507_s26, %s179_s8  }
   0x9   : > { %p1594_p5 = por %p190_p2, %p189_p0  ;;  %p1598_p6 = por %p196_p4, %p195_p3 }
   0xa   : > { %p1121_p7 = scmp.ge.s32.totalorder %s1511_s27, 1  ;;  %p241_p8 = scmp.lt.s32.totalorder %s1511_s27, 3 }
   0xc   : > { %p242_p9 = pnand %p1121_p7, %p241_p8 }
   0xd   : > { %s1123_s15 = sshll.u32 (!%p242_p9), %s1577_s28, 4  ;;  %s1169_s8 = sshll.u32 (!%p242_p9), %s1577_s28, 11 }
   0xe   : > { %245 = sbr.rel (%p242_p9) target bundleno = 724 (0x2d4), region = 48  ;;  %p274_p10 = scmp.lt.s32.totalorder (!%p242_p9), %s1123_s15, 31 }
   0xf   : > { %s1513_s17 = smov (!%p242_p9), [#allocation2]  }
  0x10   : > { %s1455_s18 = sshll.u32 (!%p242_p9), %s1513_s17, 4  ;;  %s1456_s18 = int_to_ptr.vmem [resolvable:$false] %s1455_s18 }
  0x11   : > { %s1457_s19 = scalar_lea.vmem (!%p242_p9), %s1456_s18, 4096 }
  0x13   : > { %v1359_v0 = vld [vmem:[%s1846_s1 + $0x18] sm:$0xff]   ;;  %v1360_v1 = vld [vmem:[%s1846_s1 + $0x10] sm:$0xff]   ;;  %v1361_v2 = vld [vmem:[%s1846_s1 + $0x8] sm:$0xff]   ;;  %s1860_s15 = smov (!%p274_p10, %s1123_s15), 31  ;;  %vm376_vm0 = vcmask 523264  }
  0x14   : > { %1214 = vmatprep.subr.bf16.mxu0 %v1359_v0  ;;  %v1371_v3 = vld [vmem:[%s1848_s3 + $0x38] sm:$0xff]   ;;  %s1124_s22 = sshll.u32 %s1860_s15, 2  ;;  %v1372_v4 = vld [vmem:[%s1848_s3 + $0x30] sm:$0xff]   ;;  %v1362_v5 = vld [vmem:[%s1846_s1] sm:$0xff]  }
  0x15   : > { %1215 = vmatpush3.bf16.msra.mxu0 %v1359_v0  ;;  %s1626_s16 = scalar_lea.vmem %s1845_s0, %s1124_s22  ;;  %1238 = vmatprep.subr.bf16.mxu1 %v1371_v3  ;;  %v1373_v7 = vld [vmem:[%s1848_s3 + $0x28] sm:$0xff]   ;;  %v1374_v10 = vld [vmem:[%s1848_s3 + $0x20] sm:$0xff]   ;;  %v1375_v11 = vld [vmem:[%s1848_s3 + $0x18] sm:$0xff]   ;;  %s270_s22 = sand.u32 1, %s1503_s25  }
  0x16   : > { %1216 = vmatprep.subr.bf16.mxu0 %v1360_v1  ;;  %v1363_v6 = vld [vmem:[%s1626_s16] sm:$0xff]   ;;  %1239 = vmatpush3.bf16.msra.mxu1 %v1371_v3  ;;  %v1364_v8 = vld [vmem:[%s1626_s16 + $0x8] sm:$0xff]   ;;  %v1365_v9 = vld [vmem:[%s1626_s16 + $0x10] sm:$0xff]   ;;  %s1122_s23 = sshll.u32 %s270_s22, 7  ;;  %s1805_s15 = scalar_lea.sflag [#allocation3], %s270_s22 }
  0x17   : > { %1240 = vmatprep.subr.bf16.mxu1 %v1372_v4  ;;  %1222 = vmatprep.mubr.msk.bf16.mxu0 %vm376_vm0, %v1363_v6  ;;  %v1366_v12 = vld [vmem:[%s1626_s16 + $0x18] sm:$0xff]   ;;  %v1367_v13 = vld [vmem:[%s1626_s16 + $0x20] sm:$0xff]   ;;  %v1368_v14 = vld [vmem:[%s1626_s16 + $0x28] sm:$0xff]   ;;  %s1776_s29 = scalar_lea.vmem [#allocation2], %s1122_s23 }
  0x18   : > { %v1369_v15 = vld [vmem:[%s1626_s16 + $0x30] sm:$0xff]   ;;  %v1370_v16 = vld [vmem:[%s1626_s16 + $0x38] sm:$0xff]   ;;  %v1377_v18 = vld [vmem:[%s1848_s3 + $0x8] sm:$0xff]   ;;  %s1056_s9 = sshll.u32 %s1776_s29, 4  ;;  %s1797_s16 = scalar_lea.hbm %s1852_s7, %s1169_s8  ;;  %s1799_s9 = int_to_ptr.vmem [resolvable:$true] %s1056_s9 }
  0x19   : > { %1217 = vmatpush3.bf16.msra.mxu0 %v1360_v1  ;;  %v1376_v17 = vld [vmem:[%s1848_s3 + $0x10] sm:$0xff]   ;;  %v1378_v19 = vld [vmem:[%s1848_s3] sm:$0xff]   ;;  %v1379_v20 = vld [vmem:[%s1850_s5 + $0x38] sm:$0xff]   ;;  %s1451_s28 = scalar_lea.vmem %s1799_s9, 2048  ;;  %p1458_p0 = scmp.lt.s32.totalorder %s1799_s9, %s1456_s18 }
  0x1a   : > { %1218 = vmatprep.subr.bf16.mxu0 %v1361_v2  ;;  %1241 = vmatpush3.bf16.msra.mxu1 %v1372_v4  ;;  %v1668_v21 = vld [vmem:[%s1850_s5 + $0x30] sm:$0xff]   ;;  %v1674_v22 = vld [vmem:[%s1850_s5 + $0x28] sm:$0xff]   ;;  %v1681_v23 = vld [vmem:[%s1850_s5 + $0x20] sm:$0xff]   ;;  %p1452_p11 = scmp.ne.s32.totalorder %s1799_s9, %s1451_s28  ;;  %p1459_p1 = scmp.lt.s32.totalorder %s1457_s19, %s1451_s28 }
  0x1b   : > { %1242 = vmatprep.subr.bf16.mxu1 %v1373_v7  ;;  %v1688_v24 = vld [vmem:[%s1850_s5 + $0x18] sm:$0xff]   ;;  %v1696_v26 = vld [vmem:[%s1847_s2] ss:$0 sm:$0xff] }
  0x1c   : > { %p1453_p12 = pnand %p1452_p11, %p1594_p5  ;;  %p1460_p2 = por %p1459_p1, %p1458_p0 }
  0x1d   : > { %1219 = vmatpush3.bf16.msra.mxu0 %v1361_v2 }
  0x1e   : > { %1220 = vmatprep.subr.bf16.mxu0 %v1362_v5  ;;  %1243 = vmatpush3.bf16.msra.mxu1 %v1373_v7  ;;  %p1454_p13 = pneg %p1453_p12 }
  0x1f   : > { %1244 = vmatprep.subr.bf16.mxu1 %v1374_v10 }
  0x20   : > { %p1461_p3 = pnand %p1460_p2, %p1454_p13 }
  0x21   : > { %1221 = vmatpush3.bf16.msra.mxu0 %v1362_v5 }
  0x22   : > { %1245 = vmatpush3.bf16.msra.mxu1 %v1374_v10  ;;  %1270 = vmatprep.subr.bf16.mxu0 %v1379_v20 }
  0x23   : > { %1246 = vmatprep.subr.bf16.mxu1 %v1375_v11 }
  0x24   : > { %1223 = vmatmul.mubr.msk.bf16.vlgmr.msra.gmra.mxu0 %vm376_vm0, %v1364_v8 }
  0x25   : > { %1226 = vmatprep.mubr.msk.bf16.mxu0 %vm376_vm0, %v1365_v9  ;;  %1271 = vmatpush3.bf16.msra.mxu0 %v1379_v20 }
  0x26   : > { %1247 = vmatpush3.bf16.msra.mxu1 %v1375_v11  ;;  %1272 = vmatprep.subr.bf16.mxu0 %v1668_v21 }
  0x27   : > { %1248 = vmatprep.subr.bf16.mxu1 %v1376_v17 }
  0x29   : > { %1273 = vmatpush3.bf16.msra.mxu0 %v1668_v21 }
  0x2a   : > { %1249 = vmatpush3.bf16.msra.mxu1 %v1376_v17  ;;  %1274 = vmatprep.subr.bf16.mxu0 %v1674_v22 }
  0x2b   : > { %1250 = vmatprep.subr.bf16.mxu1 %v1377_v18 }
  0x2c   : > { %1227 = vmatmul.mubr.msk.bf16.gmra.mxu0 %vm376_vm0, %v1366_v12 }
  0x2d   : > { %1230 = vmatprep.mubr.msk.bf16.mxu0 %vm376_vm0, %v1367_v13  ;;  %1275 = vmatpush3.bf16.msra.mxu0 %v1674_v22 }
  0x2e   : > { %1251 = vmatpush3.bf16.msra.mxu1 %v1377_v18  ;;  %1276 = vmatprep.subr.bf16.mxu0 %v1681_v23 }
  0x2f   : > { %1252 = vmatprep.subr.bf16.mxu1 %v1378_v19 }
  0x31   : > { %1277 = vmatpush3.bf16.msra.mxu0 %v1681_v23 }
  0x32   : > { %1253 = vmatpush3.bf16.msra.mxu1 %v1378_v19  ;;  %1278 = vmatprep.subr.bf16.mxu0 %v1688_v24 }
  0x33   : > { %1302 = vmatprep.subr.bf16.mxu1 %v1379_v20 }
  0x34   : > { %1231 = vmatmul.mubr.msk.bf16.gmra.mxu0 %vm376_vm0, %v1368_v14 }
  0x35   : > { %1234 = vmatprep.mubr.msk.bf16.mxu0 %vm376_vm0, %v1369_v15  ;;  %1279 = vmatpush3.bf16.msra.mxu0 %v1688_v24 }
  0x3c   : > { %1235 = vmatmul.mubr.msk.bf16.gmra.mxu0 %vm376_vm0, %v1370_v16 }
  0xe4   : > { %v1224_v25 = vpop.f32.mrf.mxu0 }
  0xe5   : > { %v444_v29 = vadd.f32 %v1224_v25, %v1696_v26 }
  0xe6   : > { %v435_v27 = vpop.f32.mrf.mxu0 }
  0xe7   : > { %v436_v28 = vadd.f32 %v1696_v26, %v435_v27  ;;  %v516_v36 = vmul.f32 0.1, %v444_v29  ;;  %vm500_vm3 = vcmp.gt.f32.partialorder %v444_v29, 0.0 }
  0xe8   : > { %v1225_v30 = vpop.f32.mrf.mxu0 }
  0xe9   : > { %v447_v31 = vadd.f32 %v1225_v30, %v1696_v26  ;;  %v514_v33 = vmul.f32 0.1, %v436_v28  ;;  %vm498_vm2 = vcmp.gt.f32.partialorder %v436_v28, 0.0  ;;  %v532_v47 = vsel %vm500_vm3, %v444_v29, %v516_v36  ;;  %v1386_v36 = vld [vmem:[%s1850_s5] sm:$0xff]  }
  0xea   : > { %v438_v32 = vpop.f32.mrf.mxu0 }
  0xeb   : > { %vm501_vm1 = vcmp.gt.f32.partialorder %v447_v31, 0.0  ;;  %v517_v34 = vmul.f32 0.1, %v447_v31  ;;  %v439_v35 = vadd.f32 %v1696_v26, %v438_v32  ;;  %v530_v42 = vsel %vm498_vm2, %v436_v28, %v514_v33 }
  0xec   : > { %v1228_v37 = vpop.f32.mrf.mxu0 }
  0xed   : > { %v515_v38 = vmul.f32 0.1, %v439_v35  ;;  %vm499_vm4 = vcmp.gt.f32.partialorder %v439_v35, 0.0  ;;  %v533_v40 = vsel %vm501_vm1, %v447_v31, %v517_v34  ;;  %v460_v44 = vadd.f32 %v1228_v37, %v1696_v26 }
  0xee   : > { %v451_v39 = vpop.f32.mrf.mxu0  ;;  %v547_v49 = vpack.c.bf16 %v533_v40, %v532_v47 }
  0xef   : > { %v452_v41 = vadd.f32 %v1696_v26, %v451_v39  ;;  %v531_v43 = vsel %vm499_vm4, %v439_v35, %v515_v38  ;;  %v520_v54 = vmul.f32 0.1, %v460_v44  ;;  %vm504_vm7 = vcmp.gt.f32.partialorder %v460_v44, 0.0  ;;  %v1734_v38 = vld [vmem:[%s1849_s4] ss:$0 sm:$0xff] }
  0xf0   : > { %v1229_v45 = vpop.f32.mrf.mxu0  ;;  %v546_v46 = vpack.c.bf16 %v531_v43, %v530_v42 }
  0xf1   : > { %v463_v48 = vadd.f32 %v1229_v45, %v1696_v26  ;;  %v518_v51 = vmul.f32 0.1, %v452_v41  ;;  %vm502_vm6 = vcmp.gt.f32.partialorder %v452_v41, 0.0  ;;  %v536_v1 = vsel %vm504_vm7, %v460_v44, %v520_v54 }
  0xf2   : > { %v454_v50 = vpop.f32.mrf.mxu0  ;;  %1254 = vmatprep.mubr.bf16.mxu1 %v546_v46 }
  0xf3   : > { %vm505_vm5 = vcmp.gt.f32.partialorder %v463_v48, 0.0  ;;  %v521_v52 = vmul.f32 0.1, %v463_v48  ;;  %v455_v53 = vadd.f32 %v1696_v26, %v454_v50  ;;  %1255 = vmatmul.mubr.bf16.vlgmr.msra.gmra.mxu1 %v547_v49  ;;  %v534_v60 = vsel %vm502_vm6, %v452_v41, %v518_v51 }
  0xf4   : > { %v1232_v55 = vpop.f32.mrf.mxu0  ;;  %1310 = vmatpush3.bf16.msra.mxu1 %v1379_v20 }
  0xf5   : > { %vm503_vm8 = vcmp.gt.f32.partialorder %v455_v53, 0.0  ;;  %v519_v56 = vmul.f32 0.1, %v455_v53  ;;  %1303 = vmatprep.subr.bf16.mxu1 %v1668_v21  ;;  %v537_v58 = vsel %vm505_vm5, %v463_v48, %v521_v52  ;;  %v476_v62 = vadd.f32 %v1232_v55, %v1696_v26 }
  0xf6   : > { %v467_v57 = vpop.f32.mrf.mxu0  ;;  %v549_v3 = vpack.c.bf16 %v537_v58, %v536_v1 }
  0xf7   : > { %v468_v59 = vadd.f32 %v1696_v26, %v467_v57  ;;  %v535_v61 = vsel %vm503_vm8, %v455_v53, %v519_v56  ;;  %v524_v8 = vmul.f32 0.1, %v476_v62  ;;  %vm508_vm11 = vcmp.gt.f32.partialorder %v476_v62, 0.0 }
  0xf8   : > { %v1233_v63 = vpop.f32.mrf.mxu0  ;;  %v548_v0 = vpack.c.bf16 %v535_v61, %v534_v60  ;;  %1311 = vmatpush3.bf16.msra.mxu1 %v1668_v21 }
  0xf9   : > { %v479_v2 = vadd.f32 %v1233_v63, %v1696_v26  ;;  %1304 = vmatprep.subr.bf16.mxu1 %v1674_v22  ;;  %v522_v5 = vmul.f32 0.1, %v468_v59  ;;  %vm506_vm10 = vcmp.gt.f32.partialorder %v468_v59, 0.0  ;;  %v540_v19 = vsel %vm508_vm11, %v476_v62, %v524_v8 }
  0xfa   : > { %v470_v4 = vpop.f32.mrf.mxu0  ;;  %1258 = vmatprep.mubr.bf16.mxu1 %v548_v0 }
  0xfb   : > { %vm509_vm9 = vcmp.gt.f32.partialorder %v479_v2, 0.0  ;;  %v525_v6 = vmul.f32 0.1, %v479_v2  ;;  %v471_v7 = vadd.f32 %v1696_v26, %v470_v4  ;;  %1259 = vmatmul.mubr.bf16.gmra.mxu1 %v549_v3  ;;  %v538_v14 = vsel %vm506_vm10, %v468_v59, %v522_v5 }
  0xfc   : > { %v1236_v9 = vpop.f32.mrf.mxu0  ;;  %1312 = vmatpush3.bf16.msra.mxu1 %v1674_v22 }
  0xfd   : > { %vm507_vm12 = vcmp.gt.f32.partialorder %v471_v7, 0.0  ;;  %v523_v10 = vmul.f32 0.1, %v471_v7  ;;  %1305 = vmatprep.subr.bf16.mxu1 %v1681_v23  ;;  %v541_v12 = vsel %vm509_vm9, %v479_v2, %v525_v6  ;;  %v492_v16 = vadd.f32 %v1236_v9, %v1696_v26 }
  0xfe   : > { %v483_v11 = vpop.f32.mrf.mxu0  ;;  %v551_v21 = vpack.c.bf16 %v541_v12, %v540_v19 }
  0xff   : > { %v484_v13 = vadd.f32 %v1696_v26, %v483_v11  ;;  %v539_v15 = vsel %vm507_vm12, %v471_v7, %v523_v10  ;;  %v528_v29 = vmul.f32 0.1, %v492_v16  ;;  %vm512_vm15 = vcmp.gt.f32.partialorder %v492_v16, 0.0 }
 0x100   : > { %v1237_v17 = vpop.f32.mrf.mxu0  ;;  %v550_v18 = vpack.c.bf16 %v539_v15, %v538_v14  ;;  %1313 = vmatpush3.bf16.msra.mxu1 %v1681_v23 }
 0x101   : > { %v495_v20 = vadd.f32 %v1237_v17, %v1696_v26  ;;  %1306 = vmatprep.subr.bf16.mxu1 %v1688_v24  ;;  %v526_v25 = vmul.f32 0.1, %v484_v13  ;;  %vm510_vm14 = vcmp.gt.f32.partialorder %v484_v13, 0.0  ;;  %v544_v34 = vsel %vm512_vm15, %v492_v16, %v528_v29 }
 0x102   : > { %v486_v22 = vpop.f32.mrf.mxu0  ;;  %1262 = vmatprep.mubr.bf16.mxu1 %v550_v18 }
 0x103   : > { %vm513_vm13 = vcmp.gt.f32.partialorder %v495_v20, 0.0  ;;  %v529_v27 = vmul.f32 0.1, %v495_v20  ;;  %v487_v28 = vadd.f32 %v1696_v26, %v486_v22  ;;  %1263 = vmatmul.mubr.bf16.gmra.mxu1 %v551_v21  ;;  %v542_v31 = vsel %vm510_vm14, %v484_v13, %v526_v25  ;;  %v1384_v26 = vld [vmem:[%s1850_s5 + $0x10] sm:$0xff]  }
 0x104   : > { %1314 = vmatpush3.bf16.msra.mxu1 %v1688_v24  ;;  %1280 = vmatprep.subr.bf16.mxu0 %v1384_v26  ;;  %v1385_v24 = vld [vmem:[%s1850_s5 + $0x8] sm:$0xff]  }
 0x105   : > { %vm511_vm0 = vcmp.gt.f32.partialorder %v487_v28, 0.0  ;;  %v527_v23 = vmul.f32 0.1, %v487_v28  ;;  %v545_v30 = vsel %vm513_vm13, %v495_v20, %v529_v27  ;;  %1307 = vmatprep.subr.bf16.mxu1 %v1384_v26  ;;  %1281 = vmatpush3.bf16.msra.mxu0 %v1384_v26 }
 0x106   : > { %v553_v35 = vpack.c.bf16 %v545_v30, %v544_v34  ;;  %1282 = vmatprep.subr.bf16.mxu0 %v1385_v24 }
 0x107   : > { %v543_v32 = vsel %vm511_vm0, %v487_v28, %v527_v23 }
 0x108   : > { %v552_v33 = vpack.c.bf16 %v543_v32, %v542_v31  ;;  %1315 = vmatpush3.bf16.msra.mxu1 %v1384_v26 }
 0x109   : > { %1308 = vmatprep.subr.bf16.mxu1 %v1385_v24  ;;  %1283 = vmatpush3.bf16.msra.mxu0 %v1385_v24 }
 0x10a   : > { %1266 = vmatprep.mubr.bf16.mxu1 %v552_v33  ;;  %1284 = vmatprep.subr.bf16.mxu0 %v1386_v36 }
 0x10b   : > { %1267 = vmatmul.mubr.bf16.gmra.mxu1 %v553_v35 }
 0x10c   : > { %1316 = vmatpush3.bf16.msra.mxu1 %v1385_v24 }
 0x10d   : > { %1309 = vmatprep.subr.bf16.mxu1 %v1386_v36  ;;  %1285 = vmatpush3.bf16.msra.mxu0 %v1386_v36 }
 0x110   : > { %1317 = vmatpush3.bf16.msra.mxu1 %v1386_v36 }
 0x1b3   : > { %v1256_v37 = vpop.f32.mrf.mxu1 }
 0x1b4   : > { %v668_v41 = vadd.f32 %v1256_v37, %v1734_v38 }
 0x1b5   : > { %v659_v39 = vpop.f32.mrf.mxu1 }
 0x1b6   : > { %v660_v40 = vadd.f32 %v1734_v38, %v659_v39  ;;  %v740_v48 = vmul.f32 0.1, %v668_v41  ;;  %vm724_vm3 = vcmp.gt.f32.partialorder %v668_v41, 0.0 }
 0x1b7   : > { %v1257_v42 = vpop.f32.mrf.mxu1 }
 0x1b8   : > { %v671_v43 = vadd.f32 %v1257_v42, %v1734_v38  ;;  %v738_v45 = vmul.f32 0.1, %v660_v40  ;;  %vm722_vm2 = vcmp.gt.f32.partialorder %v660_v40, 0.0  ;;  %v756_v56 = vsel %vm724_vm3, %v668_v41, %v740_v48 }
 0x1b9   : > { %v662_v44 = vpop.f32.mrf.mxu1 }
 0x1ba   : > { %vm725_vm1 = vcmp.gt.f32.partialorder %v671_v43, 0.0  ;;  %v741_v46 = vmul.f32 0.1, %v671_v43  ;;  %v663_v47 = vadd.f32 %v1734_v38, %v662_v44  ;;  %v754_v54 = vsel %vm722_vm2, %v660_v40, %v738_v45 }
 0x1bb   : > { %v1260_v49 = vpop.f32.mrf.mxu1 }
 0x1bc   : > { %vm723_vm4 = vcmp.gt.f32.partialorder %v663_v47, 0.0  ;;  %v739_v50 = vmul.f32 0.1, %v663_v47  ;;  %v757_v51 = vsel %vm725_vm1, %v671_v43, %v741_v46  ;;  %v684_v57 = vadd.f32 %v1260_v49, %v1734_v38 }
 0x1bd   : > { %v675_v52 = vpop.f32.mrf.mxu1  ;;  %v771_v60 = vpack.c.bf16 %v757_v51, %v756_v56 }
 0x1be   : > { %v676_v53 = vadd.f32 %v1734_v38, %v675_v52  ;;  %v755_v55 = vsel %vm723_vm4, %v663_v47, %v739_v50  ;;  %v744_v2 = vmul.f32 0.1, %v684_v57  ;;  %vm728_vm7 = vcmp.gt.f32.partialorder %v684_v57, 0.0  ;;  %v1755_v47 = vld [vmem:[%s1851_s6] ss:$0 sm:$0xff] }
 0x1bf   : > { %v1261_v58 = vpop.f32.mrf.mxu1  ;;  %v770_v59 = vpack.c.bf16 %v755_v55, %v754_v54 }
 0x1c0   : > { %v687_v61 = vadd.f32 %v1261_v58, %v1734_v38  ;;  %v742_v63 = vmul.f32 0.1, %v676_v53  ;;  %vm726_vm6 = vcmp.gt.f32.partialorder %v676_v53, 0.0  ;;  %v760_v13 = vsel %vm728_vm7, %v684_v57, %v744_v2 }
 0x1c1   : > { %v678_v62 = vpop.f32.mrf.mxu1  ;;  %1286 = vmatprep.mubr.bf16.mxu0 %v770_v59 }
 0x1c2   : > { %vm729_vm5 = vcmp.gt.f32.partialorder %v687_v61, 0.0  ;;  %v745_v0 = vmul.f32 0.1, %v687_v61  ;;  %v679_v1 = vadd.f32 %v1734_v38, %v678_v62  ;;  %1287 = vmatmul.mubr.bf16.vlgmr.msra.gmra.mxu0 %v771_v60  ;;  %v758_v8 = vsel %vm726_vm6, %v676_v53, %v742_v63 }
 0x1c3   : > { %v1264_v3 = vpop.f32.mrf.mxu1 }
 0x1c4   : > { %vm727_vm8 = vcmp.gt.f32.partialorder %v679_v1, 0.0  ;;  %v743_v4 = vmul.f32 0.1, %v679_v1  ;;  %v761_v6 = vsel %vm729_vm5, %v687_v61, %v745_v0  ;;  %v700_v10 = vadd.f32 %v1264_v3, %v1734_v38 }
 0x1c5   : > { %v691_v5 = vpop.f32.mrf.mxu1  ;;  %v773_v15 = vpack.c.bf16 %v761_v6, %v760_v13 }
 0x1c6   : > { %v692_v7 = vadd.f32 %v1734_v38, %v691_v5  ;;  %v759_v9 = vsel %vm727_vm8, %v679_v1, %v743_v4  ;;  %v748_v20 = vmul.f32 0.1, %v700_v10  ;;  %vm732_vm11 = vcmp.gt.f32.partialorder %v700_v10, 0.0 }
 0x1c7   : > { %v1265_v11 = vpop.f32.mrf.mxu1  ;;  %v772_v12 = vpack.c.bf16 %v759_v9, %v758_v8 }
 0x1c8   : > { %v703_v14 = vadd.f32 %v1265_v11, %v1734_v38  ;;  %v746_v17 = vmul.f32 0.1, %v692_v7  ;;  %vm730_vm10 = vcmp.gt.f32.partialorder %v692_v7, 0.0  ;;  %v764_v33 = vsel %vm732_vm11, %v700_v10, %v748_v20 }
 0x1c9   : > { %v694_v16 = vpop.f32.mrf.mxu1  ;;  %1290 = vmatprep.mubr.bf16.mxu0 %v772_v12 }
 0x1ca   : > { %vm733_vm9 = vcmp.gt.f32.partialorder %v703_v14, 0.0  ;;  %v749_v18 = vmul.f32 0.1, %v703_v14  ;;  %v695_v19 = vadd.f32 %v1734_v38, %v694_v16  ;;  %1291 = vmatmul.mubr.bf16.gmra.mxu0 %v773_v15  ;;  %v762_v29 = vsel %vm730_vm10, %v692_v7, %v746_v17 }
 0x1cb   : > { %v1268_v21 = vpop.f32.mrf.mxu1 }
 0x1cc   : > { %vm731_vm12 = vcmp.gt.f32.partialorder %v695_v19, 0.0  ;;  %v747_v22 = vmul.f32 0.1, %v695_v19  ;;  %v765_v27 = vsel %vm733_vm9, %v703_v14, %v749_v18  ;;  %v716_v30 = vadd.f32 %v1268_v21, %v1734_v38 }
 0x1cd   : > { %v707_v25 = vpop.f32.mrf.mxu1  ;;  %v775_v35 = vpack.c.bf16 %v765_v27, %v764_v33 }
 0x1ce   : > { %v708_v28 = vadd.f32 %v1734_v38, %v707_v25  ;;  %v763_v23 = vsel %vm731_vm12, %v695_v19, %v747_v22  ;;  %v752_v39 = vmul.f32 0.1, %v716_v30  ;;  %vm736_vm15 = vcmp.gt.f32.partialorder %v716_v30, 0.0 }
 0x1cf   : > { %v1269_v31 = vpop.f32.mrf.mxu1  ;;  %v774_v32 = vpack.c.bf16 %v763_v23, %v762_v29 }
 0x1d0   : > { %v719_v34 = vadd.f32 %v1269_v31, %v1734_v38  ;;  %v750_v24 = vmul.f32 0.1, %v708_v28  ;;  %vm734_vm14 = vcmp.gt.f32.partialorder %v708_v28, 0.0  ;;  %v768_v44 = vsel %vm736_vm15, %v716_v30, %v752_v39 }
 0x1d1   : > { %v710_v26 = vpop.f32.mrf.mxu1  ;;  %1294 = vmatprep.mubr.bf16.mxu0 %v774_v32 }
 0x1d2   : > { %vm737_vm13 = vcmp.gt.f32.partialorder %v719_v34, 0.0  ;;  %v753_v36 = vmul.f32 0.1, %v719_v34  ;;  %v711_v37 = vadd.f32 %v1734_v38, %v710_v26  ;;  %1295 = vmatmul.mubr.bf16.gmra.mxu0 %v775_v35  ;;  %v766_v42 = vsel %vm734_vm14, %v708_v28, %v750_v24 }
 0x1d4   : > { %vm735_vm0 = vcmp.gt.f32.partialorder %v711_v37, 0.0  ;;  %v751_v40 = vmul.f32 0.1, %v711_v37  ;;  %v769_v41 = vsel %vm737_vm13, %v719_v34, %v753_v36 }
 0x1d5   : > { %v777_v46 = vpack.c.bf16 %v769_v41, %v768_v44 }
 0x1d6   : > { %v767_v43 = vsel %vm735_vm0, %v711_v37, %v751_v40 }
 0x1d7   : > { %v776_v45 = vpack.c.bf16 %v767_v43, %v766_v42 }
 0x1d9   : > { %1298 = vmatprep.mubr.bf16.mxu1 %v776_v45 }
 0x1da   : > { %1299 = vmatmul.mubr.bf16.vlgmr.msra.gmra.mxu1 %v777_v46 }
 0x282   : > { %v1288_v38 = vpop.f32.mrf.mxu0 }
 0x283   : > { %v892_v48 = vadd.f32 %v1288_v38, %v1755_v47 }
 0x284   : > { %v883_v49 = vpop.f32.mrf.mxu0 }
 0x285   : > { %v948_v50 = vsub.f32 0.0, %v892_v48  ;;  %v884_v51 = vadd.f32 %v1755_v47, %v883_v49 }
 0x286   : > { %v1289_v52 = vpop.f32.mrf.mxu0 }
 0x287   : > { %v966_v53 = vmul.f32 1.442695, %v948_v50  ;;  %v946_v54 = vsub.f32 0.0, %v884_v51  ;;  %v895_v55 = vadd.f32 %v1289_v52, %v1755_v47 }
 0x288   : > { %v886_v56 = vpop.f32.mrf.mxu0 }
 0x289   : > { %1387 = vpow2.f32 %v966_v53  ;;  %v962_v57 = vmul.f32 1.442695, %v946_v54  ;;  %v949_v58 = vsub.f32 0.0, %v895_v55  ;;  %v887_v59 = vadd.f32 %v1755_v47, %v886_v56 }
 0x28a   : > { %v1292_v60 = vpop.f32.mrf.mxu0 }
 0x28b   : > { %1389 = vpow2.f32 %v962_v57  ;;  %v968_v61 = vmul.f32 1.442695, %v949_v58  ;;  %v947_v62 = vsub.f32 0.0, %v887_v59  ;;  %v908_v63 = vadd.f32 %v1292_v60, %v1755_v47 }
 0x28c   : > { %v899_v0 = vpop.f32.mrf.mxu0 }
 0x28d   : > { %1391 = vpow2.f32 %v968_v61  ;;  %v964_v1 = vmul.f32 1.442695, %v947_v62  ;;  %v952_v2 = vsub.f32 0.0, %v908_v63  ;;  %v900_v3 = vadd.f32 %v1755_v47, %v899_v0 }
 0x28e   : > { %v1293_v4 = vpop.f32.mrf.mxu0 }
 0x28f   : > { %1393 = vpow2.f32 %v964_v1  ;;  %v974_v5 = vmul.f32 1.442695, %v952_v2  ;;  %v950_v6 = vsub.f32 0.0, %v900_v3  ;;  %v911_v7 = vadd.f32 %v1293_v4, %v1755_v47 }
 0x290   : > { %v902_v8 = vpop.f32.mrf.mxu0 }
 0x291   : > { %1395 = vpow2.f32 %v974_v5  ;;  %v970_v9 = vmul.f32 1.442695, %v950_v6  ;;  %v953_v10 = vsub.f32 0.0, %v911_v7  ;;  %v903_v11 = vadd.f32 %v1755_v47, %v902_v8 }
 0x292   : > { %v1296_v12 = vpop.f32.mrf.mxu0 }
 0x293   : > { %1397 = vpow2.f32 %v970_v9  ;;  %v976_v13 = vmul.f32 1.442695, %v953_v10  ;;  %v951_v14 = vsub.f32 0.0, %v903_v11  ;;  %v924_v15 = vadd.f32 %v1296_v12, %v1755_v47 }
 0x294   : > { %v915_v16 = vpop.f32.mrf.mxu0 }
 0x295   : > { %1399 = vpow2.f32 %v976_v13  ;;  %v972_v17 = vmul.f32 1.442695, %v951_v14  ;;  %v956_v18 = vsub.f32 0.0, %v924_v15  ;;  %v916_v19 = vadd.f32 %v1755_v47, %v915_v16 }
 0x296   : > { %v1388_v20 = vpop.eup %1387  ;;  %v1297_v21 = vpop.f32.mrf.mxu0 }
 0x297   : > { %v996_v22 = vadd.f32 1.0, %v1388_v20  ;;  %1401 = vpow2.f32 %v972_v17  ;;  %v982_v25 = vmul.f32 1.442695, %v956_v18  ;;  %v954_v27 = vsub.f32 0.0, %v916_v19 }
 0x298   : > { %v1390_v28 = vpop.eup %1389  ;;  %v927_v29 = vadd.f32 %v1297_v21, %v1755_v47  ;;  %v918_v23 = vpop.f32.mrf.mxu0 }
 0x299   : > { %1403 = vrcp.f32 %v996_v22  ;;  %v994_v30 = vadd.f32 1.0, %v1390_v28  ;;  %v978_v31 = vmul.f32 1.442695, %v954_v27  ;;  %v919_v32 = vadd.f32 %v1755_v47, %v918_v23 }
 0x29a   : > { %v1392_v33 = vpop.eup %1391  ;;  %1405 = vpow2.f32 %v982_v25  ;;  %v957_v34 = vsub.f32 0.0, %v927_v29  ;;  %v1300_v35 = vpop.f32.mrf.mxu1 }
 0x29b   : > { %1407 = vrcp.f32 %v994_v30  ;;  %v997_v26 = vadd.f32 1.0, %v1392_v33  ;;  %v955_v24 = vsub.f32 0.0, %v919_v32  ;;  %v940_v36 = vadd.f32 %v1300_v35, %v1755_v47 }
 0x29c   : > { %v1394_v37 = vpop.eup %1393  ;;  %1409 = vpow2.f32 %v978_v31  ;;  %v984_v39 = vmul.f32 1.442695, %v957_v34  ;;  %v931_v40 = vpop.f32.mrf.mxu1 }
 0x29d   : > { %1411 = vrcp.f32 %v997_v26  ;;  %v995_v41 = vadd.f32 1.0, %v1394_v37  ;;  %v980_v42 = vmul.f32 1.442695, %v955_v24  ;;  %v960_v43 = vsub.f32 0.0, %v940_v36 }
 0x29e   : > { %v1396_v44 = vpop.eup %1395  ;;  %1413 = vpow2.f32 %v984_v39  ;;  %v932_v45 = vadd.f32 %v1755_v47, %v931_v40  ;;  %v1301_v46 = vpop.f32.mrf.mxu1 }
 0x29f   : > { %1415 = vrcp.f32 %v995_v41  ;;  %v1000_v38 = vadd.f32 1.0, %v1396_v44  ;;  %v990_v48 = vmul.f32 1.442695, %v960_v43  ;;  %v943_v49 = vadd.f32 %v1301_v46, %v1755_v47 }
 0x2a0   : > { %v1398_v50 = vpop.eup %1397  ;;  %1417 = vpow2.f32 %v980_v42  ;;  %v958_v51 = vsub.f32 0.0, %v932_v45  ;;  %v934_v52 = vpop.f32.mrf.mxu1 }
 0x2a1   : > { %1419 = vrcp.f32 %v1000_v38  ;;  %v998_v53 = vadd.f32 1.0, %v1398_v50  ;;  %v961_v54 = vsub.f32 0.0, %v943_v49  ;;  %v935_v55 = vadd.f32 %v1755_v47, %v934_v52 }
 0x2a2   : > { %v1400_v56 = vpop.eup %1399  ;;  %1421 = vpow2.f32 %v990_v48  ;;  %v986_v57 = vmul.f32 1.442695, %v958_v51 }
 0x2a3   : > { %1423 = vrcp.f32 %v998_v53  ;;  %v1001_v58 = vadd.f32 1.0, %v1400_v56  ;;  %v992_v59 = vmul.f32 1.442695, %v961_v54  ;;  %v959_v60 = vsub.f32 0.0, %v935_v55 }
 0x2a4   : > { %v1402_v61 = vpop.eup %1401  ;;  %1425 = vpow2.f32 %v986_v57 }
 0x2a5   : > { %1427 = vrcp.f32 %v1001_v58  ;;  %v999_v62 = vadd.f32 1.0, %v1402_v61  ;;  %v988_v63 = vmul.f32 1.442695, %v959_v60 }
 0x2a6   : > { %v1404_v0 = vpop.eup %1403  ;;  %1429 = vpow2.f32 %v992_v59 }
 0x2a7   : > { %v1406_v1 = vpop.eup %1405  ;;  %1028 = vst [vmem:[%s1776_s29 + $0x10] sm:$0xff] %v1404_v0  ;;  %1431 = vrcp.f32 %v999_v62 }
 0x2a8   : > { %v1408_v47 = vpop.eup %1407  ;;  %v1004_v2 = vadd.f32 1.0, %v1406_v1  ;;  %1433 = vpow2.f32 %v988_v63 }
 0x2a9   : > { %v1410_v3 = vpop.eup %1409  ;;  %1026 = vst [vmem:[%s1776_s29] sm:$0xff] %v1408_v47 }
 0x2aa   : > { %v1412_v4 = vpop.eup %1411  ;;  %1435 = vrcp.f32 %v1004_v2  ;;  %v1002_v5 = vadd.f32 1.0, %v1410_v3 }
 0x2ab   : > { %v1414_v6 = vpop.eup %1413  ;;  %1029 = vst [vmem:[%s1776_s29 + $0x18] sm:$0xff] %v1412_v4 }
 0x2ac   : > { %v1416_v7 = vpop.eup %1415  ;;  %1437 = vrcp.f32 %v1002_v5  ;;  %v1005_v8 = vadd.f32 1.0, %v1414_v6 }
 0x2ad   : > { %v1418_v9 = vpop.eup %1417  ;;  %1027 = vst [vmem:[%s1776_s29 + $0x8] sm:$0xff] %v1416_v7 }
 0x2ae   : > { %v1420_v10 = vpop.eup %1419  ;;  %1439 = vrcp.f32 %v1005_v8  ;;  %v1003_v11 = vadd.f32 1.0, %v1418_v9 }
 0x2af   : > { %v1422_v12 = vpop.eup %1421  ;;  %1032 = vst [vmem:[%s1776_s29 + $0x30] sm:$0xff] %v1420_v10 }
 0x2b0   : > { %v1424_v13 = vpop.eup %1423  ;;  %1441 = vrcp.f32 %v1003_v11  ;;  %v1008_v14 = vadd.f32 1.0, %v1422_v12 }
 0x2b1   : > { %v1426_v15 = vpop.eup %1425  ;;  %1030 = vst [vmem:[%s1776_s29 + $0x20] sm:$0xff] %v1424_v13 }
 0x2b2   : > { %v1428_v16 = vpop.eup %1427  ;;  %1443 = vrcp.f32 %v1008_v14  ;;  %v1006_v17 = vadd.f32 1.0, %v1426_v15 }
 0x2b3   : > { %v1430_v18 = vpop.eup %1429  ;;  %1033 = vst [vmem:[%s1776_s29 + $0x38] sm:$0xff] %v1428_v16 }
 0x2b4   : > { %v1432_v19 = vpop.eup %1431  ;;  %1445 = vrcp.f32 %v1006_v17  ;;  %v1009_v20 = vadd.f32 1.0, %v1430_v18 }
 0x2b5   : > { %v1434_v21 = vpop.eup %1433  ;;  %1031 = vst [vmem:[%s1776_s29 + $0x28] sm:$0xff] %v1432_v19 }
 0x2b6   : > { %1447 = vrcp.f32 %v1009_v20  ;;  %v1007_v22 = vadd.f32 1.0, %v1434_v21 }
 0x2b7   : > { %v1436_v25 = vpop.eup %1435 }
 0x2b8   : > { %1036 = vst [vmem:[%s1776_s29 + $0x50] sm:$0xff] %v1436_v25  ;;  %1449 = vrcp.f32 %v1007_v22 }
 0x2b9   : > { %v1438_v27 = vpop.eup %1437 }
 0x2ba   : > { %1034 = vst [vmem:[%s1776_s29 + $0x40] sm:$0xff] %v1438_v27 }
 0x2bb   : > { %v1440_v28 = vpop.eup %1439 }
 0x2bc   : > { %1037 = vst [vmem:[%s1776_s29 + $0x58] sm:$0xff] %v1440_v28 }
 0x2bd   : > { %v1442_v29 = vpop.eup %1441 }
 0x2be   : > { %1035 = vst [vmem:[%s1776_s29 + $0x48] sm:$0xff] %v1442_v29 }
 0x2bf   : > { %v1444_v23 = vpop.eup %1443 }
 0x2c0   : > { %1040 = vst [vmem:[%s1776_s29 + $0x70] sm:$0xff] %v1444_v23 }
 0x2c1   : > { %v1446_v30 = vpop.eup %1445 }
 0x2c2   : > { %1038 = vst [vmem:[%s1776_s29 + $0x60] sm:$0xff] %v1446_v30 }
 0x2c3   : > { %v1448_v31 = vpop.eup %1447 }
 0x2c4   : > { %1041 = vst [vmem:[%s1776_s29 + $0x78] sm:$0xff] %v1448_v31 }
 0x2c5   : > { %v1450_v32 = vpop.eup %1449 }
 0x2c6   : > { %1039 = vst [vmem:[%s1776_s29 + $0x68] sm:$0xff] %v1450_v32 }
 0x2c7   : > { %1464 = shalt.err (!%p1461_p3)
}
 0x2c8   : > { %s1465_s20 = scalar_lea.hbm %s1797_s16, 2048  ;;  %s1469_s23 = scalar_lea.hbm %s1852_s7, 4096 }
 0x2c9   : > { %p1466_p4 = scmp.ne.s32.totalorder %s1797_s16, %s1465_s20  ;;  %p1470_p9 = scmp.lt.s32.totalorder %s1797_s16, %s1852_s7 }
 0x2ca   : > { %p1471_p10 = scmp.lt.s32.totalorder %s1469_s23, %s1465_s20 }
 0x2cb   : > { %p1467_p7 = pnand %p1466_p4, %p1594_p5 }
 0x2cc   : > { %p1472_p11 = por %p1471_p10, %p1470_p9 }
 0x2cd   : > { %p1468_p8 = pneg %p1467_p7 }
 0x2cf   : > { %p1473_p12 = pnand %p1472_p11, %p1468_p8 }
 0x2d1   : > { %1476 = shalt.err (!%p1473_p12)
}
 0x2d2   : > { %s1514_s13 = smov 128   ;;  %s1515_s14 = smov 8  }
 0x2d3   : > { %1318 = dma.vmem_to_hbm [thread:$0]  (%p1594_p5), %s1799_s9, 2048, %s1797_s16, %s1805_s15, %s1514_s13, %s1514_s13, %s1515_s14  }
 0x2d4 PF: > { %p1324_p13 = scmp.ge.s32.totalorder %s1511_s27, 2  ;;  %s1071_s28 = sand.u32 1, %s1499_s24  }
 0x2d5   : > { %s1072_s17 = scalar_lea.sflag [#allocation3], %s1071_s28 }
 0x2d6   : > { %p1321_p0 = pnand %p1324_p13, %p1598_p6 }
 0x2d8   : > { %p1322_p1 = pneg %p1321_p0 }
 0x2da   : > { %1494 = dma.done.wait (%p1322_p1), %s1072_s17, 2048  }
 0x2db   : > { %1496 = vsyncadd (%p1322_p1), %s1072_s17, 4294965248  ;;  %p17_p2 = scmp.ge.s32.totalorder %s1581_s30, 4   ;;  %s1855_s24 = smov %s1503_s25 }
 0x2dc   : > { %s1856_s25 = smov %s1507_s26  ;;  %s1857_s26 = smov %s1592_s10 }
 0x2dd   : > { %s1858_s27 = smov %s1581_s30  ;;  %19 = sbr.rel (!%p17_p2) target bundleno = 3 (0x3), region = 83 }
 0x2e2   :  { %1077 = vsyncpa [#allocation3], 1 }
 0x2e3   :  { %1079 = vsyncpa [#allocation3 + $0x1], 1 }

</bundles_post_ra>
